<compile_context>
chip_gen: v5e
topology: v5e:2x2
jax: 0.10.0
libtpu: 0.0.40
codegen_flags: <defaults>
</compile_context>

<pallas_src>
from functools import partial

import jax
import jax.numpy as jnp
from jax.experimental import pallas as pl
from jax.experimental.pallas import tpu as pltpu


_CAMS_PER_STEP = 4                 # camera chunk: 16-row input block, 8-row (sublane-full) output block
_MAX_P_TILE = 64 * 1024            # pixel tile cap (multiple of 128); ~12 MiB pipeline buffers @ f32
_VMEM_LIMIT_BYTES = 48 * 1024 * 1024   # < v7x physical 64 MiB, ample headroom on v5e/v6e


def _project_kernel(a1_ref, zcol_ref, tcol_ref, cam_ref, out_ref, *, eps, cams, rows_total):
    """One grid step: `cams` cameras x one pixel tile.

    a1_ref   : VMEM (1, 4C, 4C) f32  folded per-chunk block matrix (intrinsics x post-rot, norm folded)
    zcol_ref : VMEM (1, 2C, 1)  f32  per-output-row iz coefficient (post-rot 3rd column, norm folded)
    tcol_ref : VMEM (1, 2C, 1)  f32  per-output-row folded translation (includes the final "-1")
    cam_ref  : VMEM (4C, p_tile) f32 homogeneous cam points (row 3 per camera unused; zero cols in A1)
    out_ref  : VMEM (2C, p_tile) f32 normalized (u, v) rows, already in [u0, v0, u1, v1, ...] order
    """
    C = cams
    cam = cam_ref[...]                                           # (4C, p_tile)

    # Last camera chunk can be ragged: the un-copied buffer rows hold stale VMEM.  Zero them so the
    # MXU contraction (which mixes all rows) cannot propagate non-finite garbage into valid rows.
    if rows_total % (4 * C) != 0:
        g = pl.program_id(1)
        valid = rows_total - g * (4 * C)
        row = jax.lax.broadcasted_iota(jnp.int32, cam.shape, 0)
        cam = jnp.where(row < valid, cam, 0.0)

    # Single small MXU matmul; HIGHEST precision keeps f32 accuracy (bf16 single-pass would not).
    inter = jnp.dot(a1_ref[0], cam,
                    precision=jax.lax.Precision.HIGHEST,
                    preferred_element_type=jnp.float32)          # (4C, p_tile)

    top = inter[: 2 * C, :]    # (2C, p): numerators, row-ordered exactly like the output block
    bot = inter[2 * C:, :]     # (2C, p): matching un-eps'd depths iz per output row

    inv = 1.0 / (bot + eps)    # dense (2C, p) reciprocal; hidden under HBM in the pipelined loop

    # u = num/(iz+eps) + zc*iz + tc   (zc, tc broadcast from (2C,1) along lanes)
    out_ref[...] = top * inv + bot * zcol_ref[0] + tcol_ref[0]


def _choose_p_tile(num_points):
    if num_points <= _MAX_P_TILE:
        return num_points                                   # full last dim: always a legal block
    return _MAX_P_TILE                                      # lane-aligned tile; ragged last tile is clipped


def project2adj_view(adj_cam_points, adj_cam2img, adj_post_rot, adj_post_trans,
                     height, width, eps=1e-7, channels_last=True):
    """(B,N,4,P), (B,N,3,3), (B,N,3,3), (B,N,3) -> (B,N,H,W,2) normalized pixel coords."""
    f32 = jnp.float32
    B, N, four, P = adj_cam_points.shape
    assert four == 4 and P == height * width

    M = B * N
    C = min(_CAMS_PER_STEP, M)
    n_chunks = -(-M // C)
    M_pad = n_chunks * C
    p_tile = _choose_p_tile(P)
    n_ptiles = -(-P // p_tile)

    K = adj_cam2img.reshape(M, 3, 3).astype(f32)
    if adj_post_rot is None or adj_post_trans is None:
        R = jnp.broadcast_to(jnp.eye(3, dtype=f32), (M, 3, 3))
        t = jnp.zeros((M, 3), f32)
    else:
        R = adj_post_rot.reshape(M, 3, 3).astype(f32)
        t = adj_post_trans.reshape(M, 3).astype(f32)

    scale = jnp.array([2.0 / (width - 1), 2.0 / (height - 1)], f32)     # (2,) = (sx, sy)

    # Fold post-rot[:2,:2] into the intrinsics and pre-apply the pixel normalization.
    # Done with elementwise f32 math (no tiny default-precision matmul).
    RK2 = scale[None, :, None] * (R[:, :2, 0:1] * K[:, 0:1, :] + R[:, :2, 1:2] * K[:, 1:2, :])  # (M,2,3)
    Kz = K[:, 2, :]                                   # (M, 3)  third image row -> iz
    zc = scale[None, :] * R[:, :2, 2]                 # (M, 2)  coefficient of iz after the divide
    tc = scale[None, :] * t[:, :2] - 1.0              # (M, 2)  folded translation (+ the "-1")

    if M_pad != M:
        # Pad only the tiny per-camera arrays; the big point tensor is never copied/padded.
        pad = M_pad - M
        RK2 = jnp.pad(RK2, ((0, pad), (0, 0), (0, 0)))
        Kz = jnp.pad(Kz, ((0, pad), (0, 0)))
        zc = jnp.pad(zc, ((0, pad), (0, 0)))
        tc = jnp.pad(tc, ((0, pad), (0, 0)))

    # Assemble the per-chunk block matrix A1 (4C x 4C) and the per-row columns.
    RK2g = RK2.reshape(n_chunks, C, 2, 3)
    Kzg = Kz.reshape(n_chunks, C, 3)
    A1 = jnp.zeros((n_chunks, 4 * C, 4 * C), f32)
    for c in range(C):                                # tiny static loop over camera slots
        col = slice(4 * c, 4 * c + 3)                 # homogeneous 4th row gets zero coefficients
        A1 = A1.at[:, 2 * c, col].set(RK2g[:, c, 0, :])
        A1 = A1.at[:, 2 * c + 1, col].set(RK2g[:, c, 1, :])
        A1 = A1.at[:, 2 * C + 2 * c, col].set(Kzg[:, c, :])
        A1 = A1.at[:, 2 * C + 2 * c + 1, col].set(Kzg[:, c, :])
    zcol = zc.reshape(n_chunks, 2 * C, 1)
    tcol = tc.reshape(n_chunks, 2 * C, 1)

    # TODO(synk): the unused homogeneous 4th row is still DMA'd (contiguous with XYZ); dropping it
    # needs the producer to emit (B,N,3,P) — slicing here would just move the copy.
    cam_flat = adj_cam_points.astype(f32).reshape(M * 4, P)

    kernel = partial(_project_kernel, eps=float(eps), cams=C, rows_total=M * 4)

    out = pl.pallas_call(
        kernel,
        out_shape=jax.ShapeDtypeStruct((M * 2, P), f32),
        grid_spec=pltpu.PrefetchScalarGridSpec(
            num_scalar_prefetch=0,
            grid=(n_ptiles, n_chunks),                 # pixel axis first: megacore splits the long axis
            in_specs=[
                pl.BlockSpec((1, 4 * C, 4 * C), lambda p, g: (g, 0, 0)),
                pl.BlockSpec((1, 2 * C, 1), lambda p, g: (g, 0, 0)),
                pl.BlockSpec((1, 2 * C, 1), lambda p, g: (g, 0, 0)),
                pl.BlockSpec((4 * C, p_tile), lambda p, g: (g, p)),
            ],
            out_specs=pl.BlockSpec((2 * C, p_tile), lambda p, g: (g, p)),
        ),
        compiler_params=pltpu.CompilerParams(
            dimension_semantics=("parallel", "parallel"),
            vmem_limit_bytes=_VMEM_LIMIT_BYTES),
    )(A1, zcol, tcol, cam_flat)

    pix = out.reshape(B, N, 2, height, width)
    if not channels_last:
        return pix                                     # channel-first: no extra HBM pass
    # TODO(synk): this permute is a separate whole-tensor XLA pass (~+16 B/pixel-cam); consumers
    # that accept channel-first (B,N,2,H,W) should call with channels_last=False and skip it.
    return jnp.transpose(pix, (0, 1, 3, 4, 2))


def _reference(adj_cam_points, adj_cam2img, adj_post_rot, adj_post_trans,
               height, width, eps=1e-7):
    # Pure-JAX mirror of the PyTorch forward (for correctness checking).
    hp = jax.lax.Precision.HIGHEST
    cam3 = adj_cam_points[:, :, :3, :]
    img = jnp.einsum('bnij,bnjp->bnip', adj_cam2img, cam3, precision=hp)
    z2 = img[:, :, 2:3, :]
    pix = img[:, :, :2, :] / (z2 + eps)
    pix = jnp.concatenate([pix, z2], axis=2)
    pix = jnp.einsum('bnij,bnjp->bnip', adj_post_rot, pix, precision=hp) \
        + adj_post_trans[..., None]
    pix = pix[:, :, :2, :]
    B, N, Ccoord, P = pix.shape
    pix = pix.reshape(B, N, Ccoord, height, width).transpose(0, 1, 3, 4, 2)
    pix = pix.at[..., 0].divide(width - 1)
    pix = pix.at[..., 1].divide(height - 1)
    return (pix - 0.5) * 2.0


if __name__ == "__main__":
    key = jax.random.PRNGKey(0)
    B, N, H, W = 2, 3, 8, 16        # M = 6 cameras: exercises the ragged last camera chunk (C = 4)
    P = H * W

    k1, k2, k3, k4, k5 = jax.random.split(key, 5)

    # camera-frame points: X, Y ~ N(0,1); Z (depth) bounded away from 0; homogeneous 1.
    xy = jax.random.normal(k1, (B, N, 2, P), jnp.float32)
    z = jax.random.uniform(k2, (B, N, 1, P), jnp.float32, minval=0.5, maxval=4.0)
    ones = jnp.ones((B, N, 1, P), jnp.float32)
    adj_cam_points = jnp.concatenate([xy, z, ones], axis=2)

    # intrinsics-like cam2img + small noise
    base_k = jnp.array([[20.0, 0.0, 8.0],
                        [0.0, 20.0, 4.0],
                        [0.0, 0.0, 1.0]], jnp.float32)
    adj_cam2img = base_k[None, None] + 0.01 * jax.random.normal(k3, (B, N, 3, 3), jnp.float32)

    # post-augmentation rot ~ identity + noise, small translation
    adj_post_rot = (jnp.eye(3, dtype=jnp.float32)[None, None]
                    + 0.05 * jax.random.normal(k4, (B, N, 3, 3), jnp.float32))
    adj_post_trans = 0.1 * jax.random.normal(k5, (B, N, 3), jnp.float32)

    out = project2adj_view(adj_cam_points, adj_cam2img, adj_post_rot, adj_post_trans, H, W)
    out = jax.block_until_ready(out)

    ref = _reference(adj_cam_points, adj_cam2img, adj_post_rot, adj_post_trans, H, W)

    assert out.shape == (B, N, H, W, 2), out.shape
    assert out.dtype == jnp.float32
    max_err = float(jnp.max(jnp.abs(out - ref)))
    assert jnp.allclose(out, ref, rtol=2e-4, atol=2e-4), max_err

    print("KERNEL_OK")
</pallas_src>

<mosaic_0001>
module attributes {stable_mosaic.version = 11 : i64} {
  func.func @_project_kernel(%arg0: i32, %arg1: i32, %arg2: memref<1x16x16xf32, #tpu.memory_space<vmem>>, %arg3: memref<1x8x1xf32, #tpu.memory_space<vmem>>, %arg4: memref<1x8x1xf32, #tpu.memory_space<vmem>>, %arg5: memref<16x128xf32, #tpu.memory_space<vmem>>, %arg6: memref<8x128xf32, #tpu.memory_space<vmem>>) attributes {dimension_semantics = [#tpu.dimension_semantics<parallel>, #tpu.dimension_semantics<parallel>], iteration_bounds = array<i64: 1, 2>, scalar_prefetch = 0 : i64, scratch_operands = 0 : i64, tpu.core_type = #tpu.core_type<tc>, window_params = [{transform_indices = @transform_0, window_bounds = array<i64: 1, 16, 16>}, {transform_indices = @transform_1, window_bounds = array<i64: 1, 8, 1>}, {transform_indices = @transform_2, window_bounds = array<i64: 1, 8, 1>}, {transform_indices = @transform_3, window_bounds = array<i64: 16, 128>}, {transform_indices = @transform_4, window_bounds = array<i64: 8, 128>}]} {
    %c0 = arith.constant 0 : index
    %c0_0 = arith.constant 0 : index
    %0 = vector.load %arg5[%c0, %c0_0] : memref<16x128xf32, #tpu.memory_space<vmem>>, vector<16x128xf32>
    %c16_i32 = arith.constant 16 : i32
    %1 = arith.muli %arg1, %c16_i32 : i32
    %c24_i32 = arith.constant 24 : i32
    %2 = arith.subi %c24_i32, %1 : i32
    %3 = tpu.iota {dimensions = array<i32: 0>} : vector<16x128xi32>
    %4 = vector.broadcast %2 : i32 to vector<16x128xi32>
    %5 = arith.cmpi slt, %3, %4 : vector<16x128xi32>
    %cst = arith.constant 0.000000e+00 : f32
    %6 = vector.broadcast %cst : f32 to vector<16x128xf32>
    %7 = arith.select %5, %0, %6 : vector<16x128xi1>, vector<16x128xf32>
    %c0_1 = arith.constant 0 : index
    %c0_2 = arith.constant 0 : index
    %c0_3 = arith.constant 0 : index
    %8 = vector.load %arg2[%c0_1, %c0_2, %c0_3] : memref<1x16x16xf32, #tpu.memory_space<vmem>>, vector<1x16x16xf32>
    %9 = vector.shape_cast %8 : vector<1x16x16xf32> to vector<16x16xf32>
    %cst_4 = arith.constant dense<0.000000e+00> : vector<16x128xf32>
    %10 = tpu.matmul %9, %7, %cst_4 {dimension_numbers = #tpu.dot_dimension_numbers<[1], [0], [0], [1], [0, 0, 1, 1], [], []>, precision = #tpu.contract_precision<fp32>} : vector<16x16xf32>, vector<16x128xf32>, vector<16x128xf32> -> vector<16x128xf32>
    %11 = vector.extract_strided_slice %10 {offsets = [0, 0], sizes = [8, 128], strides = [1, 1]} : vector<16x128xf32> to vector<8x128xf32>
    %12 = vector.extract_strided_slice %10 {offsets = [8, 0], sizes = [8, 128], strides = [1, 1]} : vector<16x128xf32> to vector<8x128xf32>
    %cst_5 = arith.constant 1.000000e-07 : f32
    %13 = vector.broadcast %cst_5 : f32 to vector<8x128xf32>
    %14 = arith.addf %12, %13 : vector<8x128xf32>
    %cst_6 = arith.constant 1.000000e+00 : f32
    %15 = vector.broadcast %cst_6 : f32 to vector<8x128xf32>
    %16 = arith.divf %15, %14 : vector<8x128xf32>
    %17 = arith.mulf %11, %16 : vector<8x128xf32>
    %c0_7 = arith.constant 0 : index
    %c0_8 = arith.constant 0 : index
    %c0_9 = arith.constant 0 : index
    %18 = vector.load %arg3[%c0_7, %c0_8, %c0_9] : memref<1x8x1xf32, #tpu.memory_space<vmem>>, vector<1x8x1xf32>
    %19 = vector.shape_cast %18 : vector<1x8x1xf32> to vector<8x1xf32>
    %20 = vector.broadcast %19 : vector<8x1xf32> to vector<8x128xf32>
    %21 = arith.mulf %12, %20 : vector<8x128xf32>
    %22 = arith.addf %17, %21 : vector<8x128xf32>
    %c0_10 = arith.constant 0 : index
    %c0_11 = arith.constant 0 : index
    %c0_12 = arith.constant 0 : index
    %23 = vector.load %arg4[%c0_10, %c0_11, %c0_12] : memref<1x8x1xf32, #tpu.memory_space<vmem>>, vector<1x8x1xf32>
    %24 = vector.shape_cast %23 : vector<1x8x1xf32> to vector<8x1xf32>
    %25 = vector.broadcast %24 : vector<8x1xf32> to vector<8x128xf32>
    %26 = arith.addf %22, %25 : vector<8x128xf32>
    %c0_13 = arith.constant 0 : index
    %c0_14 = arith.constant 0 : index
    %27 = vector.load %arg6[%c0_13, %c0_14] : memref<8x128xf32, #tpu.memory_space<vmem>>, vector<8x128xf32>
    tpu.vector_store %arg6[%c0_13, %c0_14], %26 {strides = array<i32>} : memref<8x128xf32, #tpu.memory_space<vmem>>, vector<8x128xf32>,
    return
  }
  func.func @transform_0(%arg0: i32, %arg1: i32) -> (i32, i32, i32) {
    %c0_i32 = arith.constant 0 : i32
    %c0_i32_0 = arith.constant 0 : i32
    %c0_i32_1 = arith.constant 0 : i32
    return %arg1, %c0_i32, %c0_i32_0 : i32, i32, i32
  }
  func.func @transform_1(%arg0: i32, %arg1: i32) -> (i32, i32, i32) {
    %c0_i32 = arith.constant 0 : i32
    %c0_i32_0 = arith.constant 0 : i32
    %c0_i32_1 = arith.constant 0 : i32
    return %arg1, %c0_i32, %c0_i32_0 : i32, i32, i32
  }
  func.func @transform_2(%arg0: i32, %arg1: i32) -> (i32, i32, i32) {
    %c0_i32 = arith.constant 0 : i32
    %c0_i32_0 = arith.constant 0 : i32
    %c0_i32_1 = arith.constant 0 : i32
    return %arg1, %c0_i32, %c0_i32_0 : i32, i32, i32
  }
  func.func @transform_3(%arg0: i32, %arg1: i32) -> (i32, i32) {
    %c0_i32 = arith.constant 0 : i32
    return %arg1, %arg0 : i32, i32
  }
  func.func @transform_4(%arg0: i32, %arg1: i32) -> (i32, i32) {
    %c0_i32 = arith.constant 0 : i32
    return %arg1, %arg0 : i32, i32
  }
}

</mosaic_0001>

<bundles_post_ra>
// kernel: tpu_custom_call.1
= control target key start
LH: loop header
LB: loop body
LE: loop exit
PB: predicated region body
PF: predicated region fallthrough
CT: control target
= control target key end

     0   :  { %9 = vsyncpa [#allocation3], 0  ;;  %s1093_s0 = inlined_call_operand.vmem [shape: f32[2,16,16], index: 0, kind: input, shape index: {}]   ;;  %s1094_s1 = inlined_call_operand.vmem [shape: f32[2,8,1], index: 1, kind: input, shape index: {}]   ;;  %s1095_s2 = inlined_call_operand.vmem [shape: f32[2,8,1], index: 2, kind: input, shape index: {}]   ;;  %s1096_s3 = inlined_call_operand.hbm [shape: f32[24,128], index: 3, kind: input, shape index: {}]   ;;  %s1097_s4 = inlined_call_operand.hbm [shape: f32[12,128], index: 4, kind: output, shape index: {}]  }
   0x1   :  { %11 = vsyncpa [#allocation3 + $0x1], 0 }
   0x2   :  { %12 = vsyncpa [#allocation4], 0 }
   0x3   :  { %14 = vsyncpa [#allocation4 + $0x1], 0  ;;  %s922_s15 = smov 0   ;;  %s924_s16 = smov 0  }
   0x4   :  { %s926_s17 = smov 0   ;;  %s928_s18 = smov 0  }
   0x5   :  { %s930_s19 = smov 0   ;;  %s932_s20 = smov 0  }
   0x6 LB: > { %s679_s21 = sadd.s32 4294967295, %s891_s20   ;;  %s680_s22 = sadd.s32 4294967294, %s891_s20   ;;  %s891_s20 = sphi %s932_s20, %s20_s20   ;;  %s887_s19 = sphi %s930_s19, %s1106_s19   ;;  %s883_s18 = sphi %s928_s18, %s1105_s18   ;;  %s879_s17 = sphi %s926_s17, %s1104_s17   ;;  %s875_s16 = sphi %s924_s16, %s1103_s16   ;;  %s871_s15 = sphi %s922_s15, %s1102_s15  }
   0x7   : > { %s29_s23 = sadd.s32 1, %s887_s19  ;;  %s119_s24 = sadd.s32 1, %s879_s17 }
   0x8   : > { %p30_p0 = scmp.ge.s32.totalorder %s29_s23, 2  ;;  %p126_p1 = scmp.ne.s32.totalorder %s879_s17, %s875_s16 }
   0x9   : > { %p127_p2 = scmp.eq.s32.totalorder %s891_s20, 0  ;;  %p132_p3 = scmp.ne.s32.totalorder %s875_s16, %s871_s15 }
   0xa   : > { %s1108_s23 = smov (%p30_p0, %s29_s23), 0  ;;  %p133_p5 = scmp.eq.s32.totalorder %s679_s21, 0 }
   0xb   : > { %p128_p4 = por %p127_p2, %p126_p1  ;;  %s114_s25 = ssub.s32 %s887_s19, %s1108_s23 }
   0xc   : > { %p158_p6 = scmp.eq.s32.totalorder %s679_s21, 1  ;;  %p117_p7 = scmp.eq.s32.totalorder %s114_s25, 0 }
   0xd   : > { %p965_p8 = por %p133_p5, %p132_p3  ;;  %p164_p10 = scmp.eq.s32.totalorder %s680_s22, 1 }
   0xe   : > { %p969_p9 = por %p158_p6, %p126_p1  ;;  %p682_p12 = scmp.ge.s32.totalorder %s891_s20, 2 }
   0xf   : > { %s974_s28 = scalar_select %p117_p7, %s879_s17, %s119_s24  }
  0x10   : > { %p976_p11 = por %p164_p10, %p132_p3  ;;  %180 = sbr.rel (%p682_p12) target bundleno = 57 (0x39), region = 16 }
  0x15   : > { %205 = sbr.rel (!%p128_p4) target bundleno = 57 (0x39), region = 32  ;;  %s206_s30 = sand.u32 (%p128_p4), 1, %s879_s17  }
  0x16   : > { %s684_s5 = sshll.u32 (%p128_p4), %s887_s19, 1  ;;  %s683_s6 = sshll.u32 (%p128_p4), %s206_s30, 4 }
  0x17   : > { %s212_s7 = ssub.s32 (%p128_p4), 3, %s684_s5  ;;  %s988_s11 = scalar_lea.sflag (%p128_p4), [#allocation3], %s206_s30 }
  0x18   : > { %p213_p13 = scmp.lt.s32.totalorder (%p128_p4), %s212_s7, 2  ;;  %s210_s12 = scalar_lea.vmem (%p128_p4), [#allocation2], %s683_s6 }
  0x1a   : > { %s1110_s7 = smov (!%p213_p13, %s212_s7), 2 }
  0x1b   : > { %s685_s8 = sshll.u32 %s1110_s7, 3 }
  0x1c   : > { %s216_s9 = ssub.s32 16, %s685_s8 }
  0x1d   : > { %s217_s10 = sshll.u32 %s216_s9, 4 }
  0x1e   : > { %218 = vsyncadd %s988_s11, %s217_s10  ;;  %p991_p0 = scmp.ne.s32.totalorder %s685_s8, 0  ;;  %s702_s14 = sshll.u32 %s887_s19, 4 }
  0x1f   : > { %s222_s24 = scalar_lea.hbm %s1096_s3, %s702_s14  ;;  %s999_s25 = sshll.u32 %s210_s12, 4  ;;  %s227_s25 = int_to_ptr.vmem [resolvable:$true] %s999_s25 }
  0x20   : > { %s224_s30 = sshll.u32 %s222_s24, 4  ;;  %s689_s5 = sshll.u32 %s1110_s7, 7  ;;  %s1002_s30 = int_to_ptr.hbm [resolvable:$true] %s224_s30 }
  0x21   : > { %s770_s6 = sshra.s32 %s1002_s30, 4  ;;  %s772_s8 = sshrl.u32 %s689_s5, 4  ;;  %s771_s6 = int_to_ptr.hbm [resolvable:$true] %s770_s6 }
  0x22   : > { %s777_s9 = scalar_lea.hbm %s771_s6, %s772_s8  ;;  %s781_s12 = scalar_lea.hbm %s1096_s3, 24 }
  0x23   : > { %p778_p1 = scmp.ne.s32.totalorder %s771_s6, %s777_s9  ;;  %p783_p4 = scmp.lt.s32.totalorder %s781_s12, %s777_s9 }
  0x25   : > { %p779_p2 = pnand %p778_p1, %p991_p0 }
  0x27   : > { %p780_p3 = pneg %p779_p2 }
  0x29   : > { %p785_p5 = pnand %p783_p4, %p780_p3 }
  0x2b   : > { %788 = shalt.err (!%p785_p5)
}
  0x2c   : > { %s789_s21 = sshra.s32 %s227_s25, 4  ;;  %s893_s24 = smov [#allocation2]   ;;  %s790_s21 = int_to_ptr.vmem [resolvable:$true] %s789_s21 }
  0x2d   : > { %s796_s22 = scalar_lea.vmem %s790_s21, %s772_s8  ;;  %s800_s6 = scalar_lea.vmem %s893_s24, 32 }
  0x2e   : > { %p797_p6 = scmp.ne.s32.totalorder %s790_s21, %s796_s22  ;;  %p802_p13 = scmp.lt.s32.totalorder %s800_s6, %s796_s22 }
  0x30   : > { %p798_p7 = pnand %p797_p6, %p991_p0 }
  0x32   : > { %p799_p10 = pneg %p798_p7 }
  0x34   : > { %p804_p1 = pnand %p802_p13, %p799_p10 }
  0x36   : > { %807 = shalt.err (!%p804_p1)
}
  0x37   : > { %s894_s10 = smov 128   ;;  %s895_s9 = smov 8  }
  0x38   : > { %232 = dma.hbm_to_vmem [thread:$0]  (%p991_p0), %s1002_s30, %s689_s5, %s227_s25, %s988_s11, %s894_s10, %s894_s10, %s895_s9  }
  0x39 PF: > { %p690_p2 = scmp.ge.s32.totalorder %s891_s20, 1  ;;  %p234_p3 = scmp.lt.s32.totalorder %s891_s20, 3 }
  0x3b   : > { %p235_p4 = pnand %p690_p2, %p234_p3 }
  0x3c   : > { %s1028_s8 = sand.u32 (!%p235_p4), 1, %s875_s16  }
  0x3d   : > { %238 = sbr.rel (%p235_p4) target bundleno = 270 (0x10e), region = 36  ;;  %s691_s14 = sshll.u32 (!%p235_p4), %s1028_s8, 4 }
  0x3e   : > { %s241_s12 = scalar_lea.sflag (!%p235_p4), [#allocation3], %s1028_s8  ;;  %s244_s13 = scalar_lea.vmem (!%p235_p4), [#allocation2], %s691_s14 }
  0x42   : > { %862 = dma.done.wait (%p965_p8), %s241_s12, 256  }
  0x43   : > { %864 = vsyncadd (%p965_p8), %s241_s12, 4294967040  ;;  %s697_s7 = sshll.u32 %s883_s18, 4  ;;  %v305_v0 = vlaneseq  ;;  %p283_p0 = scmp.lt.s32.totalorder %s883_s18, 1  ;;  %vm315_vm1 = vcmask 130048   ;;  %v302_v4 = vld [vmem:[%s244_s13 + $0x8] sm:$0xff]  ;;  %v301_v5 = vld [vmem:[%s244_s13] sm:$0xff] }
  0x44   : > { %s304_s11 = ssub.s32 24, %s697_s7  ;;  %v896_v11 = vmov 0   ;;  %s692_s13 = sshll.u32 %s1028_s8, 3 }
  0x45   : > { %v306_v1 = vshrl.u32 %v305_v0, 7  ;;  %s1039_s25 = scalar_select %p283_p0, %s883_s18, 1  ;;  %v308_v2 = vstv %s304_s11  ;;  %767 = vset.pattern.permute.xlu0 %v896_v11 }
  0x46   : > { %s699_s7 = sshll.u32 %s883_s18, 3  ;;  %s546_s18 = scalar_lea.sflag [#allocation4], %s1028_s8 }
  0x47   : > { %v307_v3 = vadd.s32 8, %v306_v1  ;;  %s703_s30 = sshll.u32 %s1039_s25, 4  ;;  %s695_s5 = sshll.u32 %s1039_s25, 3  ;;  %vm309_vm0 = vcmp.lt.s32.totalorder %v306_v1, %v308_v2 }
  0x48   : > { %s287_s22 = scalar_lea.vmem %s1093_s0, %s703_s30  ;;  %s291_s10 = scalar_lea.vmem %s1094_s1, %s695_s5  ;;  %v311_v8 = vsel %vm309_vm0, %v301_v5, 0.0 }
  0x49   : > { %vm310_vm2 = vcmp.lt.s32.totalorder %v307_v3, %v308_v2  ;;  %v314_v6 = vld [vmem:[%s287_s22 + $0x8] sm:$0xff]  ;;  %v313_v10 = vld [vmem:[%s287_s22] sm:$0xff]  ;;  %v338_v14 = vand.u32 4294901760, %v311_v8  ;;  %s295_s12 = scalar_lea.vmem %s1095_s2, %s695_s5  ;;  %s557_s30 = scalar_lea.hbm %s1097_s4, %s699_s7 }
  0x4a   : > { %v312_v7 = vsel %vm310_vm2, %v302_v4, 0.0  ;;  %v320_v9 = vsel %vm315_vm1, %v314_v6, 0  ;;  %v529_v12 = vld [vmem:[%s291_s10] sm:$0xff]  ;;  %v317_v16 = vsel %vm315_vm1, %v313_v10, 0  ;;  %s282_s5 = scalar_lea.vmem [#allocation5], %s692_s13  ;;  %s561_s26 = sshll.u32 %s557_s30, 4  ;;  %s562_s26 = int_to_ptr.hbm [resolvable:$true] %s561_s26 }
  0x4b   : > { %v336_v13 = vand.u32 4294901760, %v312_v7  ;;  %v348_v15 = vand.u32 4294901760, %v320_v9  ;;  %532 = vperm.xlu0 %767, %v529_v12   ;;  %v340_v17 = vand.u32 4294901760, %v317_v16  ;;  %v378_v20 = vsub.f32 %v311_v8, %v338_v14  ;;  %v537_v26 = vld [vmem:[%s295_s12] sm:$0xff]  ;;  %s559_s21 = sshll.u32 %s282_s5, 4  ;;  %s823_s22 = sshra.s32 %s562_s26, 4  ;;  %s560_s21 = int_to_ptr.vmem [resolvable:$true] %s559_s21  ;;  %s824_s22 = int_to_ptr.hbm [resolvable:$true] %s823_s22 }
  0x4c   : > { %s825_s24 = scalar_lea.hbm %s824_s22, 8  ;;  %s829_s9 = scalar_lea.hbm %s1097_s4, 16 }
  0x4d   : > { %704 = vmatpush.msra.mxu2 %v336_v13  ;;  %v349_v18 = vsub.f32 %v320_v9, %v348_v15  ;;  %v372_v19 = vsub.f32 %v312_v7, %v336_v13  ;;  %337 = vmatpush.msra.mxu0 %v336_v13  ;;  %v341_v21 = vsub.f32 %v317_v16, %v340_v17  ;;  %v379_v24 = vand.u32 4294901760, %v378_v20  ;;  %p826_p8 = scmp.ne.s32.totalorder %s824_s22, %s825_s24  ;;  %p830_p7 = scmp.lt.s32.totalorder %s824_s22, %s1097_s4 }
  0x4e   : > { %p831_p10 = scmp.lt.s32.totalorder %s829_s9, %s825_s24 }
  0x4f   : > { %705 = vmatpush.msra.mxu2 %v338_v14  ;;  %v350_v22 = vand.u32 4294901760, %v349_v18  ;;  %v373_v23 = vand.u32 4294901760, %v372_v19  ;;  %339 = vmatpush.msra.mxu0 %v338_v14  ;;  %v342_v25 = vand.u32 4294901760, %v341_v21  ;;  %v380_v29 = vsub.f32 %v378_v20, %v379_v24  ;;  %p827_p5 = pnand %p826_p8, %p969_p9 }
  0x50   : > { %p832_p13 = por %p831_p10, %p830_p7 }
  0x51   : > { %408 = vmatpush.msrb.mxu2 %v372_v19  ;;  %v351_v27 = vsub.f32 %v349_v18, %v350_v22  ;;  %v374_v28 = vsub.f32 %v372_v19, %v373_v23  ;;  %471 = vmatpush.msrb.mxu0 %v373_v23  ;;  %v343_v30 = vsub.f32 %v341_v21, %v342_v25  ;;  %v381_v33 = vand.u32 4294901760, %v380_v29  ;;  %p828_p6 = pneg %p827_p5 }
  0x53   : > { %411 = vmatpush.msrb.mxu2 %v378_v20  ;;  %v352_v31 = vand.u32 4294901760, %v351_v27  ;;  %v375_v32 = vand.u32 4294901760, %v374_v28  ;;  %475 = vmatpush.msrb.mxu0 %v379_v24  ;;  %v344_v34 = vand.u32 4294901760, %v343_v30  ;;  %p833_p1 = pnand %p832_p13, %p828_p6 }
  0x54   : > { %540 = vperm.xlu0 %767, %v537_v26  }
  0x55   : > { %353 = vmatmul.f32.vlgmr.msra.gmra.mxu2 %v352_v31  ;;  %706 = vmatpush.msra.mxu3 %v375_v32 }
  0x56   : > { %376 = vmatpush.msra.mxu1 %v375_v32  ;;  %345 = vmatmul.f32.vlgmr.msra.gmra.mxu0 %v344_v34 }
  0x57   : > { %707 = vmatpush.msra.mxu3 %v381_v33 }
  0x58   : > { %388 = vmatmul.f32.vlgmr.msra.gmra.mxu3 %v348_v15  ;;  %382 = vmatpush.msra.mxu1 %v381_v33 }
  0x59   : > { %438 = vmatpush.msrb.mxu3 %v336_v13  ;;  %384 = vmatmul.f32.vlgmr.msra.gmra.mxu1 %v340_v17 }
  0x5a   : > { %500 = vmatpush.msrb.mxu1 %v336_v13 }
  0x5b   : > { %440 = vmatpush.msrb.mxu3 %v338_v14 }
  0x5c   : > { %502 = vmatpush.msrb.mxu1 %v338_v14 }
  0x5d   : > { %414 = vmatmul.f32.vlgmr.msrb.gmra.mxu2 %v341_v21 }
  0x5e   : > { %477 = vmatmul.f32.vlgmr.msrb.gmra.mxu0 %v340_v17 }
  0x60   : > { %444 = vmatmul.f32.vlgmr.msrb.gmra.mxu3 %v342_v25 }
  0x61   : > { %504 = vmatmul.f32.vlgmr.msrb.gmra.mxu1 %v340_v17 }
  0x65   : > { %419 = vmatmul.f32.gmra.mxu2 %v349_v18 }
  0x66   : > { %481 = vmatmul.f32.gmra.mxu0 %v348_v15 }
  0x68   : > { %450 = vmatmul.f32.gmra.mxu3 %v350_v22 }
  0x69   : > { %508 = vmatmul.f32.gmra.mxu1 %v348_v15 }
  0xbd   : > { %v533_v63 = vpop.permute.xlu0 %532 }
  0xc6   : > { %v541_v8 = vpop.permute.xlu0 %540 }
  0xd3   : > { %v346_v35 = vpop.f32.mrf.mxu0 }
  0xd6   : > { %v385_v38 = vpop.f32.mrf.mxu1 }
  0xd7   : > { %v386_v53 = vadd.f32 %v385_v38, %v346_v35 }
  0xd8   : > { %v354_v36 = vpop.f32.mrf.mxu2 }
  0xdb   : > { %v389_v37 = vpop.f32.mrf.mxu3  ;;  %v478_v40 = vpop.f32.mrf.mxu0 }
  0xdc   : > { %v390_v43 = vadd.f32 %v389_v37, %v354_v36 }
  0xde   : > { %v505_v42 = vpop.f32.mrf.mxu1 }
  0xe0   : > { %v415_v39 = vpop.f32.mrf.mxu2 }
  0xe1   : > { %v416_v54 = vadd.f32 %v415_v39, %v386_v53 }
  0xe3   : > { %v445_v41 = vpop.f32.mrf.mxu3  ;;  %v482_v47 = vpop.f32.mrf.mxu0 }
  0xe4   : > { %v446_v56 = vadd.f32 %v445_v41, %v416_v54 }
  0xe6   : > { %v509_v49 = vpop.f32.mrf.mxu1  ;;  %v479_v60 = vadd.f32 %v478_v40, %v446_v56 }
  0xe8   : > { %v420_v44 = vpop.f32.mrf.mxu2  ;;  %v506_v2 = vadd.f32 %v505_v42, %v479_v60 }
  0xe9   : > { %v421_v45 = vadd.f32 %v420_v44, %v390_v43 }
  0xeb   : > { %v451_v46 = vpop.f32.mrf.mxu3 }
  0xec   : > { %v452_v48 = vadd.f32 %v451_v46, %v421_v45 }
  0xee   : > { %v483_v50 = vadd.f32 %v482_v47, %v452_v48 }
  0xf0   : > { %v510_v51 = vadd.f32 %v509_v49, %v483_v50 }
  0xf2   : > { %v512_v52 = vadd.f32 1e-07, %v510_v51  ;;  %v535_v5 = vmul.f32 %v533_v63, %v510_v51 }
  0xf4   : > { %768 = vrcp.f32 %v512_v52  ;;  %v524_v59 = vand.u32 2147483648, %v512_v52  ;;  %v522_v62 = vand.u32 2147483647, %v512_v52  ;;  %vm518_vm4 = vweird.f32 %v512_v52 }
  0xf6   : > { %v525_v1 = vor.u32 1.1754944e-38, %v524_v59  ;;  %vm523_vm6 = vcmp.eq.f32.partialorder %v522_v62, 8.507059e+37 }
  0xfa   : > { %v769_v55 = vpop.eup %768 }
  0xfb   : > { %v514_v57 = vmul.f32 %v769_v55, %v512_v52  ;;  %vm519_vm3 = vweird.f32 %v769_v55 }
  0xfc   : > { %vm520_vm5 = vmor %vm518_vm4, %vm519_vm3 }
  0xfd   : > { %v515_v58 = vsub.f32 1.0, %v514_v57 }
  0xff   : > { %v516_v61 = vmul.f32 %v769_v55, %v515_v58 }
 0x101   : > { %v517_v0 = vadd.f32 %v769_v55, %v516_v61 }
 0x103   : > { %v521_v3 = vsel %vm520_vm5, %v769_v55, %v517_v0 }
 0x104   : > { %v526_v4 = vsel %vm523_vm6, %v525_v1, %v521_v3 }
 0x105   : > { %v528_v6 = vmul.f32 %v526_v4, %v506_v2 }
 0x107   : > { %v536_v7 = vadd.f32 %v535_v5, %v528_v6 }
 0x109   : > { %v543_v9 = vadd.f32 %v541_v8, %v536_v7 }
 0x10b   : > { %544 = vst [vmem:[%s282_s5] sm:$0xff] %v543_v9 }
 0x10c   : > { %836 = shalt.err (!%p833_p1)
}
 0x10d   : > { %709 = dma.vmem_to_hbm [thread:$0]  (%p969_p9), %s560_s21, 128, %s562_s26, %s546_s18  }
 0x10e PF: > { %s573_s8 = sand.u32 1, %s871_s15   ;;  %p712_p2 = pnand %p682_p12, %p976_p11 }
 0x10f   : > { %s574_s13 = scalar_lea.sflag [#allocation4], %s573_s8 }
 0x110   : > { %p713_p3 = pneg %p712_p2 }
 0x112   : > { %866 = dma.done.wait (%p713_p3), %s574_s13, 128  }
 0x113   : > { %868 = vsyncadd (%p713_p3), %s574_s13, 4294967168  ;;  %s20_s20 = sadd.s32 1, %s891_s20   ;;  %s1102_s15 = smov %s875_s16 }
 0x114   : > { %p17_p4 = scmp.ge.s32.totalorder %s20_s20, 4   ;;  %s1103_s16 = smov %s879_s17 }
 0x115   : > { %s1104_s17 = smov %s974_s28  ;;  %s1105_s18 = smov %s887_s19 }
 0x116   : > { %s1106_s19 = smov %s1108_s23  ;;  %19 = sbr.rel (!%p17_p4) target bundleno = 6 (0x6), region = 90 }
 0x11b   :  { %580 = vsyncpa [#allocation3], 1 }
 0x11c   :  { %582 = vsyncpa [#allocation3 + $0x1], 1 }
 0x11d   :  { %583 = vsyncpa [#allocation4], 1 }
 0x11e   :  { %585 = vsyncpa [#allocation4 + $0x1], 1 }

</bundles_post_ra>
